<compile_context>
chip_gen: v7x
topology: tpu7x:2x2x1
jax: 0.10.0
libtpu: 0.0.40
codegen_flags: <defaults>
</compile_context>

<pallas_src>
import numpy as np
import jax
import jax.numpy as jnp
from jax.experimental import pallas as pl
from jax.experimental.pallas import tpu as pltpu


def _linear_space(backcast_length, forecast_length, is_forecast=True):
    horizon = forecast_length if is_forecast else backcast_length
    return np.arange(0, horizon) / horizon


def _seasonality_basis(p, t):
    # Matches seasonality_model: p1 rows of cos, p2 rows of sin, concatenated.
    p1, p2 = (p // 2, p // 2) if p % 2 == 0 else (p // 2, p // 2 + 1)
    s1 = np.array([np.cos(2 * np.pi * i * t) for i in range(p1)])
    s2 = np.array([np.sin(2 * np.pi * i * t) for i in range(p2)])
    return np.concatenate([s1, s2], axis=0).astype(np.float32)  # (p, horizon)


def _round_up(x, m):
    return ((x + m - 1) // m) * m


def _seasonality_kernel(x_ref, w1_ref, b1_ref, w2_ref, b2_ref, w3_ref, b3_ref,
                        w4_ref, b4_ref, wsbf_ref, out_ref):
    # 4-layer MLP with ReLU, then one fused matmul against the theta-folded
    # trig basis producing [backcast | forecast] for this batch tile.
    cdt = w1_ref.dtype  # MXU operand dtype (bf16 fast path, f32 reference path)
    h = jnp.dot(x_ref[...], w1_ref[...], preferred_element_type=jnp.float32)
    h = jnp.maximum(h + b1_ref[...], 0.0)
    h = jnp.dot(h.astype(cdt), w2_ref[...], preferred_element_type=jnp.float32)
    h = jnp.maximum(h + b2_ref[...], 0.0)
    h = jnp.dot(h.astype(cdt), w3_ref[...], preferred_element_type=jnp.float32)
    h = jnp.maximum(h + b3_ref[...], 0.0)
    h = jnp.dot(h.astype(cdt), w4_ref[...], preferred_element_type=jnp.float32)
    h = jnp.maximum(h + b4_ref[...], 0.0)
    # share_thetas=True, bias-free: theta_{b,f} folded into wsbf host-side.
    out_ref[...] = jnp.dot(h.astype(cdt), wsbf_ref[...],
                           preferred_element_type=jnp.float32)


def seasonality_block_forward(x, params, s_back, s_fore, *,
                              block_rows=1024,
                              compute_dtype=jnp.bfloat16):
    # squeeze_last_dim equivalent
    if x.ndim == 3 and x.shape[-1] == 1:
        x = x[..., 0]
    B, backcast_len = x.shape
    forecast_len = s_fore.shape[1]
    total = backcast_len + forecast_len

    # Fold the shared theta projection into the trig basis (exact up to fp
    # reassociation): W_sbf = wt @ [S_back | S_fore]  -> (units, total).
    s_cat = jnp.concatenate([jnp.asarray(s_back, jnp.float32),
                             jnp.asarray(s_fore, jnp.float32)], axis=1)
    w_sbf = jnp.dot(params["wt"].astype(jnp.float32), s_cat)

    cdt = compute_dtype
    w1 = params["w1"].astype(cdt)
    w2 = params["w2"].astype(cdt)
    w3 = params["w3"].astype(cdt)
    w4 = params["w4"].astype(cdt)
    w_sbf = w_sbf.astype(cdt)
    b1 = params["b1"].astype(jnp.float32)
    b2 = params["b2"].astype(jnp.float32)
    b3 = params["b3"].astype(jnp.float32)
    b4 = params["b4"].astype(jnp.float32)

    # Batch tile: as large as reasonable (pipelining), multiple of the sublane
    # packing (8 rows f32, 16 rows bf16); pad the batch so it divides evenly.
    row_mult = 8 if cdt == jnp.float32 else 16
    bm = min(block_rows, _round_up(B, row_mult))
    b_pad = _round_up(B, bm)
    x_p = x.astype(cdt)
    if b_pad != B:
        x_p = jnp.pad(x_p, ((0, b_pad - B), (0, 0)))

    def _resident(shape):
        # Weights / biases / basis: same block every grid step -> stay in VMEM.
        return pl.BlockSpec(shape, lambda i: (0,) * len(shape))

    grid = (b_pad // bm,)
    out = pl.pallas_call(
        _seasonality_kernel,
        out_shape=jax.ShapeDtypeStruct((b_pad, total), jnp.float32),
        grid_spec=pltpu.PrefetchScalarGridSpec(
            num_scalar_prefetch=0,
            grid=grid,
            in_specs=[
                pl.BlockSpec((bm, backcast_len), lambda i: (i, 0)),
                _resident(w1.shape), _resident(b1.shape),
                _resident(w2.shape), _resident(b2.shape),
                _resident(w3.shape), _resident(b3.shape),
                _resident(w4.shape), _resident(b4.shape),
                _resident(w_sbf.shape),
            ],
            out_specs=pl.BlockSpec((bm, total), lambda i: (i, 0)),
        ),
        compiler_params=pltpu.CompilerParams(
            dimension_semantics=("parallel",),     # megacore on v7x
            vmem_limit_bytes=32 * 1024 * 1024,     # safe on v5e/v6e/v7x; tiles are tiny
        ),
    )(x_p, w1, b1, w2, b2, w3, b3, w4, b4, w_sbf)

    out = out[:B]
    return out[:, :backcast_len], out[:, backcast_len:]


def init_params(key, backcast_length, units, thetas_dim):
    # Deterministic init mimicking nn.Linear default U(-1/sqrt(fan_in), 1/sqrt(fan_in)).
    keys = jax.random.split(key, 10)

    def lin(kw, kb, fan_in, fan_out, bias=True):
        bound = 1.0 / np.sqrt(fan_in)
        w = jax.random.uniform(kw, (fan_in, fan_out), jnp.float32, -bound, bound)
        if not bias:
            return w, None
        b = jax.random.uniform(kb, (1, fan_out), jnp.float32, -bound, bound)
        return w, b

    w1, b1 = lin(keys[0], keys[1], backcast_length, units)
    w2, b2 = lin(keys[2], keys[3], units, units)
    w3, b3 = lin(keys[4], keys[5], units, units)
    w4, b4 = lin(keys[6], keys[7], units, units)
    wt, _ = lin(keys[8], keys[9], units, thetas_dim, bias=False)
    return dict(w1=w1, b1=b1, w2=w2, b2=b2, w3=w3, b3=b3, w4=w4, b4=b4, wt=wt)


def reference_forward(x, params, s_back, s_fore):
    # Plain-JAX f32 reference with the original (unfolded) module math.
    h = jax.nn.relu(x @ params["w1"] + params["b1"])
    h = jax.nn.relu(h @ params["w2"] + params["b2"])
    h = jax.nn.relu(h @ params["w3"] + params["b3"])
    h = jax.nn.relu(h @ params["w4"] + params["b4"])
    theta = h @ params["wt"]
    return theta @ s_back, theta @ s_fore


if __name__ == "__main__":
    # Small shapes consistent with the module: nb_harmonics=None so
    # thetas_dim == forecast_length, share_thetas=True.
    batch = 8
    units = 32
    backcast_length = 16
    forecast_length = 8
    thetas_dim = forecast_length

    key = jax.random.PRNGKey(0)
    k_x, k_p = jax.random.split(key)
    x = jax.random.normal(k_x, (batch, backcast_length), jnp.float32)
    params = init_params(k_p, backcast_length, units, thetas_dim)

    t_back = _linear_space(backcast_length, forecast_length, is_forecast=False)
    t_fore = _linear_space(backcast_length, forecast_length, is_forecast=True)
    s_back = jnp.asarray(_seasonality_basis(thetas_dim, t_back))   # (p, backcast)
    s_fore = jnp.asarray(_seasonality_basis(thetas_dim, t_fore))   # (p, forecast)

    ref_b, ref_f = reference_forward(x, params, s_back, s_fore)

    # f32 kernel path: tight check (only reassociation from the theta folding).
    back32, fore32 = seasonality_block_forward(
        x, params, s_back, s_fore, compute_dtype=jnp.float32)
    jax.block_until_ready((back32, fore32))
    np.testing.assert_allclose(np.asarray(back32), np.asarray(ref_b),
                               rtol=1e-4, atol=1e-4)
    np.testing.assert_allclose(np.asarray(fore32), np.asarray(ref_f),
                               rtol=1e-4, atol=1e-4)

    # Default fast path: bf16 MXU operands, f32 accumulation.
    backcast, forecast = seasonality_block_forward(x, params, s_back, s_fore)
    jax.block_until_ready((backcast, forecast))
    assert backcast.shape == (batch, backcast_length)
    assert forecast.shape == (batch, forecast_length)
    np.testing.assert_allclose(np.asarray(backcast), np.asarray(ref_b),
                               rtol=5e-2, atol=5e-2)
    np.testing.assert_allclose(np.asarray(forecast), np.asarray(ref_f),
                               rtol=5e-2, atol=5e-2)

    print("KERNEL_OK")
</pallas_src>

<mosaic_0001>
module attributes {stable_mosaic.version = 11 : i64} {
  func.func @_seasonality_kernel(%arg0: i32, %arg1: memref<8x16xf32, #tpu.memory_space<vmem>>, %arg2: memref<16x32xf32, #tpu.memory_space<vmem>>, %arg3: memref<1x32xf32, #tpu.memory_space<vmem>>, %arg4: memref<32x32xf32, #tpu.memory_space<vmem>>, %arg5: memref<1x32xf32, #tpu.memory_space<vmem>>, %arg6: memref<32x32xf32, #tpu.memory_space<vmem>>, %arg7: memref<1x32xf32, #tpu.memory_space<vmem>>, %arg8: memref<32x32xf32, #tpu.memory_space<vmem>>, %arg9: memref<1x32xf32, #tpu.memory_space<vmem>>, %arg10: memref<32x24xf32, #tpu.memory_space<vmem>>, %arg11: memref<8x24xf32, #tpu.memory_space<vmem>>) attributes {dimension_semantics = [#tpu.dimension_semantics<parallel>], iteration_bounds = array<i64: 1>, scalar_prefetch = 0 : i64, scratch_operands = 0 : i64, tpu.core_type = #tpu.core_type<tc>, window_params = [{transform_indices = @transform_0, window_bounds = array<i64: 8, 16>}, {pipeline_mode = #tpu.pipeline_mode<synchronous>, transform_indices = @transform_1, window_bounds = array<i64: 16, 32>}, {pipeline_mode = #tpu.pipeline_mode<synchronous>, transform_indices = @transform_2, window_bounds = array<i64: 1, 32>}, {pipeline_mode = #tpu.pipeline_mode<synchronous>, transform_indices = @transform_3, window_bounds = array<i64: 32, 32>}, {pipeline_mode = #tpu.pipeline_mode<synchronous>, transform_indices = @transform_4, window_bounds = array<i64: 1, 32>}, {pipeline_mode = #tpu.pipeline_mode<synchronous>, transform_indices = @transform_5, window_bounds = array<i64: 32, 32>}, {pipeline_mode = #tpu.pipeline_mode<synchronous>, transform_indices = @transform_6, window_bounds = array<i64: 1, 32>}, {pipeline_mode = #tpu.pipeline_mode<synchronous>, transform_indices = @transform_7, window_bounds = array<i64: 32, 32>}, {pipeline_mode = #tpu.pipeline_mode<synchronous>, transform_indices = @transform_8, window_bounds = array<i64: 1, 32>}, {pipeline_mode = #tpu.pipeline_mode<synchronous>, transform_indices = @transform_9, window_bounds = array<i64: 32, 24>}, {transform_indices = @transform_10, window_bounds = array<i64: 8, 24>}]} {
    %c0 = arith.constant 0 : index
    %c0_0 = arith.constant 0 : index
    %0 = vector.load %arg1[%c0, %c0_0] : memref<8x16xf32, #tpu.memory_space<vmem>>, vector<8x16xf32>
    %c0_1 = arith.constant 0 : index
    %c0_2 = arith.constant 0 : index
    %1 = vector.load %arg2[%c0_1, %c0_2] : memref<16x32xf32, #tpu.memory_space<vmem>>, vector<16x32xf32>
    %cst = arith.constant dense<0.000000e+00> : vector<8x32xf32>
    %2 = tpu.matmul %0, %1, %cst {dimension_numbers = #tpu.dot_dimension_numbers<[1], [0], [0], [1], [0, 0, 1, 1], [], []>} : vector<8x16xf32>, vector<16x32xf32>, vector<8x32xf32> -> vector<8x32xf32>
    %c0_3 = arith.constant 0 : index
    %c0_4 = arith.constant 0 : index
    %3 = vector.load %arg3[%c0_3, %c0_4] : memref<1x32xf32, #tpu.memory_space<vmem>>, vector<1x32xf32>
    %4 = vector.broadcast %3 : vector<1x32xf32> to vector<8x32xf32>
    %5 = arith.addf %2, %4 : vector<8x32xf32>
    %cst_5 = arith.constant 0.000000e+00 : f32
    %6 = vector.broadcast %cst_5 : f32 to vector<8x32xf32>
    %7 = arith.maximumf %5, %6 : vector<8x32xf32>
    %c0_6 = arith.constant 0 : index
    %c0_7 = arith.constant 0 : index
    %8 = vector.load %arg4[%c0_6, %c0_7] : memref<32x32xf32, #tpu.memory_space<vmem>>, vector<32x32xf32>
    %cst_8 = arith.constant dense<0.000000e+00> : vector<8x32xf32>
    %9 = tpu.matmul %7, %8, %cst_8 {dimension_numbers = #tpu.dot_dimension_numbers<[1], [0], [0], [1], [0, 0, 1, 1], [], []>} : vector<8x32xf32>, vector<32x32xf32>, vector<8x32xf32> -> vector<8x32xf32>
    %c0_9 = arith.constant 0 : index
    %c0_10 = arith.constant 0 : index
    %10 = vector.load %arg5[%c0_9, %c0_10] : memref<1x32xf32, #tpu.memory_space<vmem>>, vector<1x32xf32>
    %11 = vector.broadcast %10 : vector<1x32xf32> to vector<8x32xf32>
    %12 = arith.addf %9, %11 : vector<8x32xf32>
    %cst_11 = arith.constant 0.000000e+00 : f32
    %13 = vector.broadcast %cst_11 : f32 to vector<8x32xf32>
    %14 = arith.maximumf %12, %13 : vector<8x32xf32>
    %c0_12 = arith.constant 0 : index
    %c0_13 = arith.constant 0 : index
    %15 = vector.load %arg6[%c0_12, %c0_13] : memref<32x32xf32, #tpu.memory_space<vmem>>, vector<32x32xf32>
    %cst_14 = arith.constant dense<0.000000e+00> : vector<8x32xf32>
    %16 = tpu.matmul %14, %15, %cst_14 {dimension_numbers = #tpu.dot_dimension_numbers<[1], [0], [0], [1], [0, 0, 1, 1], [], []>} : vector<8x32xf32>, vector<32x32xf32>, vector<8x32xf32> -> vector<8x32xf32>
    %c0_15 = arith.constant 0 : index
    %c0_16 = arith.constant 0 : index
    %17 = vector.load %arg7[%c0_15, %c0_16] : memref<1x32xf32, #tpu.memory_space<vmem>>, vector<1x32xf32>
    %18 = vector.broadcast %17 : vector<1x32xf32> to vector<8x32xf32>
    %19 = arith.addf %16, %18 : vector<8x32xf32>
    %cst_17 = arith.constant 0.000000e+00 : f32
    %20 = vector.broadcast %cst_17 : f32 to vector<8x32xf32>
    %21 = arith.maximumf %19, %20 : vector<8x32xf32>
    %c0_18 = arith.constant 0 : index
    %c0_19 = arith.constant 0 : index
    %22 = vector.load %arg8[%c0_18, %c0_19] : memref<32x32xf32, #tpu.memory_space<vmem>>, vector<32x32xf32>
    %cst_20 = arith.constant dense<0.000000e+00> : vector<8x32xf32>
    %23 = tpu.matmul %21, %22, %cst_20 {dimension_numbers = #tpu.dot_dimension_numbers<[1], [0], [0], [1], [0, 0, 1, 1], [], []>} : vector<8x32xf32>, vector<32x32xf32>, vector<8x32xf32> -> vector<8x32xf32>
    %c0_21 = arith.constant 0 : index
    %c0_22 = arith.constant 0 : index
    %24 = vector.load %arg9[%c0_21, %c0_22] : memref<1x32xf32, #tpu.memory_space<vmem>>, vector<1x32xf32>
    %25 = vector.broadcast %24 : vector<1x32xf32> to vector<8x32xf32>
    %26 = arith.addf %23, %25 : vector<8x32xf32>
    %cst_23 = arith.constant 0.000000e+00 : f32
    %27 = vector.broadcast %cst_23 : f32 to vector<8x32xf32>
    %28 = arith.maximumf %26, %27 : vector<8x32xf32>
    %c0_24 = arith.constant 0 : index
    %c0_25 = arith.constant 0 : index
    %29 = vector.load %arg10[%c0_24, %c0_25] : memref<32x24xf32, #tpu.memory_space<vmem>>, vector<32x24xf32>
    %cst_26 = arith.constant dense<0.000000e+00> : vector<8x24xf32>
    %30 = tpu.matmul %28, %29, %cst_26 {dimension_numbers = #tpu.dot_dimension_numbers<[1], [0], [0], [1], [0, 0, 1, 1], [], []>} : vector<8x32xf32>, vector<32x24xf32>, vector<8x24xf32> -> vector<8x24xf32>
    %c0_27 = arith.constant 0 : index
    %c0_28 = arith.constant 0 : index
    %31 = vector.load %arg11[%c0_27, %c0_28] : memref<8x24xf32, #tpu.memory_space<vmem>>, vector<8x24xf32>
    tpu.vector_store %arg11[%c0_27, %c0_28], %30 {strides = array<i32>} : memref<8x24xf32, #tpu.memory_space<vmem>>, vector<8x24xf32>,
    return
  }
  func.func @transform_0(%arg0: i32) -> (i32, i32) {
    %c0_i32 = arith.constant 0 : i32
    %c0_i32_0 = arith.constant 0 : i32
    return %arg0, %c0_i32 : i32, i32
  }
  func.func @transform_1(%arg0: i32) -> (i32, i32) {
    %c0_i32 = arith.constant 0 : i32
    %c0_i32_0 = arith.constant 0 : i32
    %c0_i32_1 = arith.constant 0 : i32
    return %c0_i32, %c0_i32_0 : i32, i32
  }
  func.func @transform_2(%arg0: i32) -> (i32, i32) {
    %c0_i32 = arith.constant 0 : i32
    %c0_i32_0 = arith.constant 0 : i32
    %c0_i32_1 = arith.constant 0 : i32
    return %c0_i32, %c0_i32_0 : i32, i32
  }
  func.func @transform_3(%arg0: i32) -> (i32, i32) {
    %c0_i32 = arith.constant 0 : i32
    %c0_i32_0 = arith.constant 0 : i32
    %c0_i32_1 = arith.constant 0 : i32
    return %c0_i32, %c0_i32_0 : i32, i32
  }
  func.func @transform_4(%arg0: i32) -> (i32, i32) {
    %c0_i32 = arith.constant 0 : i32
    %c0_i32_0 = arith.constant 0 : i32
    %c0_i32_1 = arith.constant 0 : i32
    return %c0_i32, %c0_i32_0 : i32, i32
  }
  func.func @transform_5(%arg0: i32) -> (i32, i32) {
    %c0_i32 = arith.constant 0 : i32
    %c0_i32_0 = arith.constant 0 : i32
    %c0_i32_1 = arith.constant 0 : i32
    return %c0_i32, %c0_i32_0 : i32, i32
  }
  func.func @transform_6(%arg0: i32) -> (i32, i32) {
    %c0_i32 = arith.constant 0 : i32
    %c0_i32_0 = arith.constant 0 : i32
    %c0_i32_1 = arith.constant 0 : i32
    return %c0_i32, %c0_i32_0 : i32, i32
  }
  func.func @transform_7(%arg0: i32) -> (i32, i32) {
    %c0_i32 = arith.constant 0 : i32
    %c0_i32_0 = arith.constant 0 : i32
    %c0_i32_1 = arith.constant 0 : i32
    return %c0_i32, %c0_i32_0 : i32, i32
  }
  func.func @transform_8(%arg0: i32) -> (i32, i32) {
    %c0_i32 = arith.constant 0 : i32
    %c0_i32_0 = arith.constant 0 : i32
    %c0_i32_1 = arith.constant 0 : i32
    return %c0_i32, %c0_i32_0 : i32, i32
  }
  func.func @transform_9(%arg0: i32) -> (i32, i32) {
    %c0_i32 = arith.constant 0 : i32
    %c0_i32_0 = arith.constant 0 : i32
    %c0_i32_1 = arith.constant 0 : i32
    return %c0_i32, %c0_i32_0 : i32, i32
  }
  func.func @transform_10(%arg0: i32) -> (i32, i32) {
    %c0_i32 = arith.constant 0 : i32
    %c0_i32_0 = arith.constant 0 : i32
    return %arg0, %c0_i32 : i32, i32
  }
}

</mosaic_0001>

<bundles_post_ra>
// kernel: tpu_custom_call.1
= control target key start
LH: loop header
LB: loop body
LE: loop exit
PB: predicated region body
PF: predicated region fallthrough
CT: control target
= control target key end

     0   :  { %15 = vsyncpa [#allocation3], 0  ;;  %s994_s0 = inlined_call_operand.hbm [shape: f32[8,16], index: 0, kind: input, shape index: {}]   ;;  %s995_s1 = inlined_call_operand.hbm [shape: f32[16,32], index: 1, kind: input, shape index: {}]   ;;  %s996_s2 = inlined_call_operand.vmem [shape: f32[1,32], index: 2, kind: input, shape index: {}]   ;;  %s997_s3 = inlined_call_operand.vmem [shape: f32[32,32], index: 3, kind: input, shape index: {}]   ;;  %s998_s4 = inlined_call_operand.vmem [shape: f32[1,32], index: 4, kind: input, shape index: {}]   ;;  %s999_s5 = inlined_call_operand.vmem [shape: f32[32,32], index: 5, kind: input, shape index: {}]   ;;  %s1000_s6 = inlined_call_operand.hbm [shape: f32[1,32], index: 6, kind: input, shape index: {}]   ;;  %s1001_s7 = inlined_call_operand.hbm [shape: f32[32,32], index: 7, kind: input, shape index: {}]   ;;  %s1002_s8 = inlined_call_operand.hbm [shape: f32[1,32], index: 8, kind: input, shape index: {}]   ;;  %s1003_s9 = inlined_call_operand.vmem [shape: f32[32,24], index: 9, kind: input, shape index: {}]   ;;  %s1004_s10 = inlined_call_operand.hbm [shape: f32[8,24], index: 10, kind: output, shape index: {}]  }
   0x1   :  { %16 = vsyncpa [#allocation6], 0 }
   0x2   :  { %17 = vsyncpa [#allocation9], 0 }
   0x3   :  { %18 = vsyncpa [#allocation4], 0  ;;  %s796_s13 = smov [#allocation5]   ;;  %s656_s17 = scalar_lea.hbm %s995_s1, 256 }
   0x4   :  { %s34_s14 = sshll.u32 %s796_s13, 4  ;;  %p657_p0 = scmp.ne.s32.totalorder %s995_s1, %s656_s17  ;;  %s35_s14 = int_to_ptr.vmem [resolvable:$true] %s34_s14 }
   0x5   :  { %p660_p1 = scmp.lt.u32.totalorder %s656_s17, %s995_s1 }
   0x7   :  { %p662_p2 = pnand %p660_p1, %p657_p0 }
   0x9   :  { %665 = shalt.err (!%p662_p2)
}
   0xa   :  { %s666_s22 = scalar_lea.vmem %s35_s14, 256  ;;  %p671_p4 = scmp.lt.s32.totalorder %s35_s14, %s35_s14 }
   0xb   :  { %p667_p3 = scmp.ne.s32.totalorder %s35_s14, %s666_s22  ;;  %p672_p5 = scmp.lt.s32.totalorder %s666_s22, %s666_s22 }
   0xd   :  { %p673_p6 = por %p672_p5, %p671_p4 }
   0xf   :  { %p674_p7 = pnand %p673_p6, %p667_p3 }
  0x11   :  { %677 = shalt.err (!%p674_p7)
}
  0x12   :  { %s797_s23 = smov 128   ;;  %s798_s24 = smov 8  }
  0x13   :  { %40 = dma.hbm_to_vmem [thread:$0]  %s995_s1, 256, %s35_s14, [#allocation6], %s797_s23, %s797_s23, %s798_s24  }
  0x14   :  { %s799_s27 = smov [#allocation8]   ;;  %s800_s29 = smov [#allocation2]  }
  0x15   :  { %s64_s28 = sshll.u32 %s799_s27, 4  ;;  %s25_s30 = sshll.u32 %s800_s29, 4  ;;  %s65_s28 = int_to_ptr.vmem [resolvable:$true] %s64_s28  ;;  %s26_s30 = int_to_ptr.vmem [resolvable:$true] %s25_s30 }
  0x16   :  { %s678_s13 = scalar_lea.hbm %s1001_s7, 512 }
  0x17   :  { %p679_p8 = scmp.ne.s32.totalorder %s1001_s7, %s678_s13  ;;  %p682_p9 = scmp.lt.u32.totalorder %s678_s13, %s1001_s7 }
  0x19   :  { %p684_p10 = pnand %p682_p9, %p679_p8 }
  0x1b   :  { %687 = shalt.err (!%p684_p10)
}
  0x1c   :  { %s688_s1 = scalar_lea.vmem %s65_s28, 512  ;;  %p693_p12 = scmp.lt.s32.totalorder %s65_s28, %s65_s28 }
  0x1d   :  { %p689_p11 = scmp.ne.s32.totalorder %s65_s28, %s688_s1  ;;  %p694_p13 = scmp.lt.s32.totalorder %s688_s1, %s688_s1 }
  0x1f   :  { %p695_p0 = por %p694_p13, %p693_p12 }
  0x21   :  { %p696_p1 = pnand %p695_p0, %p689_p11 }
  0x23   :  { %699 = shalt.err (!%p696_p1)
}
  0x24   :  { %70 = dma.hbm_to_vmem [thread:$0]  %s1001_s7, 512, %s65_s28, [#allocation9], %s797_s23, %s797_s23, %s798_s24  }
  0x25   :  { %s700_s22 = scalar_lea.hbm %s994_s0, 128 }
  0x26   :  { %p701_p2 = scmp.ne.s32.totalorder %s994_s0, %s700_s22  ;;  %p704_p3 = scmp.lt.u32.totalorder %s700_s22, %s994_s0 }
  0x28   :  { %p706_p4 = pnand %p704_p3, %p701_p2 }
  0x2a   :  { %709 = shalt.err (!%p706_p4)
}
  0x2b   :  { %s710_s11 = scalar_lea.vmem %s26_s30, 128  ;;  %p715_p6 = scmp.lt.s32.totalorder %s26_s30, %s26_s30 }
  0x2c   :  { %p711_p5 = scmp.ne.s32.totalorder %s26_s30, %s710_s11  ;;  %p716_p7 = scmp.lt.s32.totalorder %s710_s11, %s710_s11 }
  0x2e   :  { %p717_p8 = por %p716_p7, %p715_p6 }
  0x30   :  { %p718_p9 = pnand %p717_p8, %p711_p5 }
  0x32   :  { %721 = shalt.err (!%p718_p9)
}
  0x33   :  { %28 = dma.hbm_to_vmem [thread:$0]  %s994_s0, 128, %s26_s30, [#allocation3]  }
  0x34   :  { %s801_s24 = smov [#allocation7]   ;;  %s802_s12 = smov [#allocation10]  }
  0x35   :  { %s55_s28 = sshll.u32 %s801_s24, 4  ;;  %s77_s13 = sshll.u32 %s802_s12, 4  ;;  %s56_s28 = int_to_ptr.vmem [resolvable:$true] %s55_s28  ;;  %s78_s13 = int_to_ptr.vmem [resolvable:$true] %s77_s13 }
  0x36   :  { %s722_s17 = scalar_lea.hbm %s1000_s6, 16 }
  0x37   :  { %p723_p10 = scmp.ne.s32.totalorder %s1000_s6, %s722_s17  ;;  %p726_p11 = scmp.lt.u32.totalorder %s722_s17, %s1000_s6 }
  0x39   :  { %p728_p12 = pnand %p726_p11, %p723_p10 }
  0x3b   :  { %731 = shalt.err (!%p728_p12)
}
  0x3c   :  { %s732_s0 = scalar_lea.vmem %s56_s28, 16  ;;  %s736_s30 = scalar_lea.vmem %s56_s28, 32 }
  0x3d   :  { %p733_p13 = scmp.ne.s32.totalorder %s56_s28, %s732_s0  ;;  %p737_p0 = scmp.lt.s32.totalorder %s56_s28, %s56_s28 }
  0x3e   :  { %p738_p1 = scmp.lt.s32.totalorder %s736_s30, %s732_s0 }
  0x40   :  { %p739_p2 = por %p738_p1, %p737_p0 }
  0x42   :  { %p740_p3 = pnand %p739_p2, %p733_p13 }
  0x44   :  { %743 = shalt.err (!%p740_p3)
}
  0x45   :  { %58 = dma.hbm_to_vmem [thread:$0]  %s1000_s6, 16, %s56_s28, [#allocation6]  }
  0x46   :  { %s744_s26 = scalar_lea.hbm %s1002_s8, 16 }
  0x47   :  { %p745_p4 = scmp.ne.s32.totalorder %s1002_s8, %s744_s26  ;;  %p748_p5 = scmp.lt.u32.totalorder %s744_s26, %s1002_s8 }
  0x49   :  { %p750_p6 = pnand %p748_p5, %p745_p4 }
  0x4b   :  { %753 = shalt.err (!%p750_p6)
}
  0x4c   :  { %s754_s23 = scalar_lea.vmem %s78_s13, 16  ;;  %s758_s24 = scalar_lea.vmem %s78_s13, 32 }
  0x4d   :  { %p755_p7 = scmp.ne.s32.totalorder %s78_s13, %s754_s23  ;;  %p759_p8 = scmp.lt.s32.totalorder %s78_s13, %s78_s13 }
  0x4e   :  { %p760_p9 = scmp.lt.s32.totalorder %s758_s24, %s754_s23 }
  0x50   :  { %p761_p10 = por %p760_p9, %p759_p8 }
  0x52   :  { %p762_p11 = pnand %p761_p10, %p755_p7 }
  0x54   :  { %765 = shalt.err (!%p762_p11)
}
  0x55   :  { %80 = dma.hbm_to_vmem [thread:$0]  %s1002_s8, 16, %s78_s13, [#allocation9]  }
  0x56   :  { %788 = dma.done.wait [#allocation3], 128  }
  0x57   :  { %789 = vsyncadd [#allocation3], 4294967168 }
  0x58   :  { %790 = dma.done.wait [#allocation6], 272  }
  0x59   :  { %791 = vsyncadd [#allocation6], 4294967024 }
  0x5a   :  { %792 = dma.done.wait [#allocation9], 528  }
  0x5b   :  { %793 = vsyncadd [#allocation9], 4294966768  ;;  %v803_v0 = vmov 0.0|0.0   ;;  %vm804_vm0 = vmmov 0   ;;  %v805_v1 = vmov 0.0   ;;  %v99_v2 = vld [vmem:[#allocation5] sm:$0xff] }
  0x5c   :  { %618 = vmatprep.subr.bf16.mxu0 %v803_v0  ;;  %571 = vmatprep.mubr.msk.f32.mxu0 %vm804_vm0, %v805_v1  ;;  %v100_v3 = vld [vmem:[#allocation5 + $0x8] sm:$0xff]  ;;  %v183_v5 = vld [vmem:[%s997_s3] sm:$0xff]  ;;  %v184_v6 = vld [vmem:[%s997_s3 + $0x8] sm:$0xff]  ;;  %vm108_vm1 = vcmask 130048   ;;  %vm194_vm2 = vcmask 261120   ;;  %s806_s28 = smov [#allocation11]  }
  0x5d   :  { %621 = vmatprep.subr.bf16.mxu1 %v803_v0  ;;  %582 = vmatprep.mubr.msk.f32.mxu1 %vm804_vm0, %v805_v1  ;;  %v619_v4 = vpack.c.bf16 %v100_v3, %v99_v2  ;;  %v622_v7 = vpack.c.bf16 %v184_v6, %v183_v5  ;;  %v98_v8 = vld [vmem:[#allocation2] sm:$0xff]  ;;  %v185_v9 = vld [vmem:[%s997_s3 + $0x10] sm:$0xff]  ;;  %v186_v10 = vld [vmem:[%s997_s3 + $0x18] sm:$0xff]  ;;  %s524_s8 = sshll.u32 %s806_s28, 4  ;;  %vm516_vm3 = vcmask 195584   ;;  %s525_s8 = int_to_ptr.vmem [resolvable:$true] %s524_s8 }
  0x5e   :  { %v625_v11 = vpack.c.bf16 %v186_v10, %v185_v9  ;;  %v269_v12 = vld [vmem:[%s999_s5] sm:$0xff]  ;;  %v270_v13 = vld [vmem:[%s999_s5 + $0x8] sm:$0xff]  ;;  %v271_v20 = vld [vmem:[%s999_s5 + $0x10] sm:$0xff]  ;;  %s766_s12 = scalar_lea.vmem %s525_s8, 128  ;;  %p771_p13 = scmp.lt.s32.totalorder %s525_s8, %s525_s8 }
  0x5f   :  { %620 = vmatpush3.bf16.msra.mxu0 %v619_v4  ;;  %623 = vmatpush3.bf16.msra.mxu1 %v622_v7  ;;  %v628_v14 = vpack.c.bf16 %v270_v13, %v269_v12  ;;  %v535_v15 = vld [vmem:[%s996_s2] ss:$0 sm:$0xff]  ;;  %v272_v21 = vld [vmem:[%s999_s5 + $0x18] sm:$0xff]  ;;  %v355_v24 = vld [vmem:[#allocation8 + $0x8] sm:$0xff]  ;;  %p767_p12 = scmp.ne.s32.totalorder %s525_s8, %s766_s12  ;;  %p772_p0 = scmp.lt.s32.totalorder %s766_s12, %s766_s12 }
  0x60   :  { %627 = vmatprep.subr.bf16.mxu0 %v803_v0  ;;  %624 = vmatprep.subr.bf16.mxu1 %v803_v0  ;;  %v631_v22 = vpack.c.bf16 %v272_v21, %v271_v20  ;;  %v354_v23 = vld [vmem:[#allocation8] sm:$0xff]  ;;  %v356_v31 = vld [vmem:[#allocation8 + $0x10] sm:$0xff]  ;;  %v357_v32 = vld [vmem:[#allocation8 + $0x18] sm:$0xff] }
  0x61   :  { %v634_v25 = vpack.c.bf16 %v355_v24, %v354_v23  ;;  %v537_v26 = vld [vmem:[%s998_s4] ss:$0 sm:$0xff]  ;;  %v637_v33 = vpack.c.bf16 %v357_v32, %v356_v31  ;;  %v440_v35 = vld [vmem:[%s1003_s9 + $0x8] sm:$0xff]  ;;  %v539_v37 = vld [vmem:[#allocation7] ss:$0 sm:$0xff]  ;;  %p773_p1 = por %p772_p0, %p771_p13 }
  0x62   :  { %572 = vmatmul.mubr.msk.f32.vlgmr.msra.gmra.mrb[0].mxu0 %vm108_vm1, %v98_v8  ;;  %v439_v34 = vld [vmem:[%s1003_s9] sm:$0xff]  ;;  %v441_v42 = vld [vmem:[%s1003_s9 + $0x10] sm:$0xff]  ;;  %v442_v43 = vld [vmem:[%s1003_s9 + $0x18] sm:$0xff] }
  0x63   :  { %593 = vmatprep.mubr.msk.f32.mxu0 %vm804_vm0, %v805_v1  ;;  %626 = vmatpush3.bf16.msra.mxu1 %v625_v11  ;;  %v640_v36 = vpack.c.bf16 %v440_v35, %v439_v34  ;;  %v643_v44 = vpack.c.bf16 %v442_v43, %v441_v42  ;;  %v541_v45 = vld [vmem:[#allocation10] ss:$0 sm:$0xff]  ;;  %p774_p2 = pnand %p773_p1, %p767_p12 }
  0x64   :  { %633 = vmatprep.subr.bf16.mxu1 %v803_v0  ;;  %629 = vmatpush3.bf16.msra.mxu0 %v628_v14 }
  0x65   :  { %630 = vmatprep.subr.bf16.mxu0 %v803_v0 }
  0x68   :  { %632 = vmatpush3.bf16.msra.mxu0 %v631_v22 }
  0x69   :  { %639 = vmatprep.subr.bf16.mxu0 %v803_v0 }
 0x135   :  { %v178_v16 = vpop.f32.mrb[0].mxu0 }
 0x136   :  { %v179_v17 = vadd.f32 %v535_v15, %v178_v16  ;;  %v573_v18 = vpop.f32.mrb[1].mxu0 }
 0x138   :  { %v182_v19 = vmax.f32 %v179_v17, 0.0 }
 0x13a   :  { %583 = vmatmul.mubr.msk.f32.vlgmr.msra.gmra.mrb[0].mxu1 %vm194_vm2, %v182_v19 }
 0x13b   :  { %604 = vmatprep.mubr.msk.f32.mxu1 %vm804_vm0, %v805_v1  ;;  %635 = vmatpush3.bf16.msra.mxu1 %v634_v25 }
 0x13c   :  { %636 = vmatprep.subr.bf16.mxu1 %v803_v0 }
 0x13f   :  { %638 = vmatpush3.bf16.msra.mxu1 %v637_v33 }
 0x20d   :  { %v264_v27 = vpop.f32.mrb[0].mxu1 }
 0x20e   :  { %v265_v28 = vadd.f32 %v537_v26, %v264_v27  ;;  %v584_v29 = vpop.f32.mrb[1].mxu1 }
 0x210   :  { %v268_v30 = vmax.f32 %v265_v28, 0.0 }
 0x212   :  { %594 = vmatmul.mubr.msk.f32.vlgmr.msra.gmra.mrb[2].mxu0 %vm194_vm2, %v268_v30 }
 0x213   :  { %615 = vmatprep.mubr.msk.f32.mxu0 %vm804_vm0, %v805_v1  ;;  %641 = vmatpush3.bf16.msra.mxu0 %v640_v36 }
 0x214   :  { %642 = vmatprep.subr.bf16.mxu0 %v803_v0 }
 0x217   :  { %644 = vmatpush3.bf16.msra.mxu0 %v643_v44 }
 0x2e5   :  { %v349_v38 = vpop.f32.mrb[2].mxu0 }
 0x2e6   :  { %v350_v39 = vadd.f32 %v539_v37, %v349_v38  ;;  %v595_v40 = vpop.f32.mrb[3].mxu0 }
 0x2e8   :  { %v353_v41 = vmax.f32 %v350_v39, 0.0 }
 0x2ea   :  { %605 = vmatmul.mubr.msk.f32.vlgmr.msra.gmra.mrb[2].mxu1 %vm194_vm2, %v353_v41 }
 0x3bd   :  { %v434_v46 = vpop.f32.mrb[2].mxu1 }
 0x3be   :  { %v435_v47 = vadd.f32 %v541_v45, %v434_v46  ;;  %v606_v48 = vpop.f32.mrb[3].mxu1 }
 0x3c0   :  { %v438_v49 = vmax.f32 %v435_v47, 0.0 }
 0x3c2   :  { %616 = vmatmul.mubr.msk.f32.vlgmr.msra.gmra.mrb[4].mxu0 %vm194_vm2, %v438_v49 }
 0x495   :  { %v512_v50 = vpop.f32.mrb[4].mxu0 }
 0x496   :  { %v617_v51 = vpop.f32.mrb[5].mxu0  ;;  %517 = vst.msk [vmem:[#allocation11] sm:$0xff] %vm516_vm3, %v512_v50 }
 0x497   :  { %777 = shalt.err (!%p774_p2)
}
 0x498   :  { %s778_s15 = scalar_lea.hbm %s1004_s10, 128 }
 0x499   :  { %p779_p3 = scmp.ne.s32.totalorder %s1004_s10, %s778_s15  ;;  %p782_p4 = scmp.lt.u32.totalorder %s778_s15, %s1004_s10 }
 0x49b   :  { %p784_p5 = pnand %p782_p4, %p779_p3 }
 0x49d   :  { %787 = shalt.err (!%p784_p5)
}
 0x49e   :  { %527 = dma.vmem_to_hbm [thread:$0]  %s525_s8, 128, %s1004_s10, [#allocation4]  }
 0x49f   :  { %794 = dma.done.wait [#allocation4], 128  }
 0x4a0   :  { %795 = vsyncadd [#allocation4], 4294967168 }
 0x4a1   :  { %531 = vsyncpa [#allocation3], 1 }
 0x4a2   :  { %532 = vsyncpa [#allocation6], 1 }
 0x4a3   :  { %533 = vsyncpa [#allocation9], 1 }
 0x4a4   :  { %534 = vsyncpa [#allocation4], 1 }

</bundles_post_ra>
